<compile_context>
chip_gen: v7x
topology: tpu7x:2x2x1
jax: 0.10.0
libtpu: 0.0.40
codegen_flags: <defaults>
</compile_context>

<pallas_src>
import jax
import jax.numpy as jnp
from jax.experimental import pallas as pl
from jax.experimental.pallas import tpu as pltpu

# Max rows per batch tile (see header: 4 MiB/buffer at 128 padded lanes, f32).
_TB_MAX = 8192


def _logreg_kernel(x_ref, w_ref, b_ref, o_ref):
    # x_ref: (TB, F) VMEM (streamed), w_ref: (F, 1) VMEM (resident),
    # b_ref: (1, 1) SMEM scalar, o_ref: (TB, 1) VMEM (streamed).
    logits = jnp.dot(x_ref[...], w_ref[...], preferred_element_type=jnp.float32)
    logits = logits + b_ref[0, 0]                 # scalar bias from SMEM
    o_ref[...] = jax.nn.sigmoid(logits).astype(o_ref.dtype)


def logistic_regression(x, weight, bias):
    """x: (B, F) f32; weight: (1, F) f32 (PyTorch Linear layout); bias: (1,) f32."""
    B, F = x.shape
    w = weight.reshape(F, 1).astype(jnp.float32)   # transpose of PyTorch (1, F)
    b = bias.reshape(1, 1).astype(jnp.float32)

    # Batch tile: multiple of 8 sublanes, capped for VMEM budget; pad B so the
    # grid divides evenly (partial tiles would otherwise touch OOB rows).
    if B <= _TB_MAX:
        tb = max(8, pl.cdiv(B, 8) * 8)
        b_pad = tb
    else:
        tb = _TB_MAX
        b_pad = pl.cdiv(B, tb) * tb

    if b_pad != B:
        x_in = jnp.zeros((b_pad, F), dtype=jnp.float32).at[:B].set(x)
    else:
        x_in = x.astype(jnp.float32)

    num_tiles = b_pad // tb

    out = pl.pallas_call(
        _logreg_kernel,
        out_shape=jax.ShapeDtypeStruct((b_pad, 1), jnp.float32),
        grid_spec=pltpu.PrefetchScalarGridSpec(
            num_scalar_prefetch=0,
            grid=(num_tiles,),
            in_specs=[
                pl.BlockSpec((tb, F), lambda i: (i, 0)),             # streamed x
                pl.BlockSpec((F, 1), lambda i: (0, 0)),              # resident w
                pl.BlockSpec(memory_space=pltpu.MemorySpace.SMEM),   # scalar bias
            ],
            out_specs=pl.BlockSpec((tb, 1), lambda i: (i, 0)),
        ),
        compiler_params=pltpu.CompilerParams(
            dimension_semantics=("parallel",),      # shard batch tiles across TCs (v7x)
            vmem_limit_bytes=32 * 1024 * 1024,      # explicit budget, safe on v5e/v6e/v7x
        ),
    )(x_in, w, b)

    return out[:B]


if __name__ == "__main__":
    key = jax.random.PRNGKey(0)
    kx, kw, kb = jax.random.split(key, 3)

    B, F = 8, 32                                  # batch=8, n_input_features=32
    x = jax.random.normal(kx, (B, F), dtype=jnp.float32)

    # Deterministic parameter init (mimics nn.Linear uniform(-1/sqrt(F), 1/sqrt(F))).
    bound = 1.0 / jnp.sqrt(jnp.float32(F))
    weight = jax.random.uniform(kw, (1, F), minval=-bound, maxval=bound,
                                dtype=jnp.float32)
    bias = jax.random.uniform(kb, (1,), minval=-bound, maxval=bound,
                              dtype=jnp.float32)

    y = logistic_regression(x, weight, bias)
    jax.block_until_ready(y)

    # Reference check against plain JAX.
    y_ref = jax.nn.sigmoid(x @ weight.T + bias)
    assert y.shape == (B, 1)
    assert jnp.allclose(y, y_ref, atol=1e-5, rtol=1e-5)

    # Also exercise a batch that needs padding / multiple tiles.
    B2 = 20
    x2 = jax.random.normal(kx, (B2, F), dtype=jnp.float32)
    y2 = logistic_regression(x2, weight, bias)
    jax.block_until_ready(y2)
    y2_ref = jax.nn.sigmoid(x2 @ weight.T + bias)
    assert y2.shape == (B2, 1)
    assert jnp.allclose(y2, y2_ref, atol=1e-5, rtol=1e-5)

    print("KERNEL_OK")
</pallas_src>

<mosaic_0001>
module attributes {stable_mosaic.version = 11 : i64} {
  func.func @_logreg_kernel(%arg0: i32, %arg1: memref<8x32xf32, #tpu.memory_space<vmem>>, %arg2: memref<32x1xf32, #tpu.memory_space<vmem>>, %arg3: memref<1x1xf32, #tpu.memory_space<smem>>, %arg4: memref<8x1xf32, #tpu.memory_space<vmem>>) attributes {dimension_semantics = [#tpu.dimension_semantics<parallel>], iteration_bounds = array<i64: 1>, scalar_prefetch = 0 : i64, scratch_operands = 0 : i64, tpu.core_type = #tpu.core_type<tc>, window_params = [{transform_indices = @transform_0, window_bounds = array<i64: 8, 32>}, {pipeline_mode = #tpu.pipeline_mode<synchronous>, transform_indices = @transform_1, window_bounds = array<i64: 32, 1>}, {transform_indices = @transform_2, window_bounds = array<i64: 1, 1>}, {transform_indices = @transform_3, window_bounds = array<i64: 8, 1>}]} {
    %c0 = arith.constant 0 : index
    %c0_0 = arith.constant 0 : index
    %0 = vector.load %arg1[%c0, %c0_0] : memref<8x32xf32, #tpu.memory_space<vmem>>, vector<8x32xf32>
    %c0_1 = arith.constant 0 : index
    %c0_2 = arith.constant 0 : index
    %1 = vector.load %arg2[%c0_1, %c0_2] : memref<32x1xf32, #tpu.memory_space<vmem>>, vector<32x1xf32>
    %cst = arith.constant dense<0.000000e+00> : vector<8x1xf32>
    %2 = tpu.matmul %0, %1, %cst {dimension_numbers = #tpu.dot_dimension_numbers<[1], [0], [0], [1], [0, 0, 1, 1], [], []>} : vector<8x32xf32>, vector<32x1xf32>, vector<8x1xf32> -> vector<8x1xf32>
    %c0_3 = arith.constant 0 : index
    %c0_4 = arith.constant 0 : index
    %3 = memref.load %arg3[%c0_3, %c0_4] : memref<1x1xf32, #tpu.memory_space<smem>>
    %4 = vector.broadcast %3 : f32 to vector<8x1xf32>
    %5 = arith.addf %2, %4 : vector<8x1xf32>
    %6 = arith.negf %5 : vector<8x1xf32>
    %7 = math.exp %6 : vector<8x1xf32>
    %cst_5 = arith.constant 1.000000e+00 : f32
    %8 = vector.broadcast %cst_5 : f32 to vector<8x1xf32>
    %9 = arith.addf %8, %7 : vector<8x1xf32>
    %10 = arith.divf %8, %9 : vector<8x1xf32>
    %c0_6 = arith.constant 0 : index
    %c0_7 = arith.constant 0 : index
    %11 = vector.load %arg4[%c0_6, %c0_7] : memref<8x1xf32, #tpu.memory_space<vmem>>, vector<8x1xf32>
    tpu.vector_store %arg4[%c0_6, %c0_7], %10 {strides = array<i32>} : memref<8x1xf32, #tpu.memory_space<vmem>>, vector<8x1xf32>,
    return
  }
  func.func @transform_0(%arg0: i32) -> (i32, i32) {
    %c0_i32 = arith.constant 0 : i32
    %c0_i32_0 = arith.constant 0 : i32
    return %arg0, %c0_i32 : i32, i32
  }
  func.func @transform_1(%arg0: i32) -> (i32, i32) {
    %c0_i32 = arith.constant 0 : i32
    %c0_i32_0 = arith.constant 0 : i32
    %c0_i32_1 = arith.constant 0 : i32
    return %c0_i32, %c0_i32_0 : i32, i32
  }
  func.func @transform_2(%arg0: i32) -> (i32, i32) {
    %c0_i32 = arith.constant 0 : i32
    %c0_i32_0 = arith.constant 0 : i32
    %c0_i32_1 = arith.constant 0 : i32
    return %c0_i32, %c0_i32_0 : i32, i32
  }
  func.func @transform_3(%arg0: i32) -> (i32, i32) {
    %c0_i32 = arith.constant 0 : i32
    %c0_i32_0 = arith.constant 0 : i32
    return %arg0, %c0_i32 : i32, i32
  }
}

</mosaic_0001>

<bundles_post_ra>
// kernel: tpu_custom_call.1
= control target key start
LH: loop header
LB: loop body
LE: loop exit
PB: predicated region body
PF: predicated region fallthrough
CT: control target
= control target key end

     0   :  { %v139_v0 = vmov 0.0|0.0   ;;  %vm140_vm0 = vmmov 0   ;;  %v141_v4 = vmov 0.0   ;;  %vm22_vm1 = vcmask 261120   ;;  %s183_s1 = inlined_call_operand.vmem [shape: f32[32,1], index: 1, kind: input, shape index: {}]   ;;  %s184_s0 = inlined_call_operand.vmem [shape: f32[8,32], index: 0, kind: input, shape index: {}]   ;;  %s185_s2 = inlined_call_operand.<no memory space> [shape: f32[1,1], index: 2, kind: input, shape index: {}]   ;;  %s186_s3 = inlined_call_operand.vmem [shape: f32[8,1], index: 3, kind: output, shape index: {}]  }
   0x1   :  { %126 = vmatprep.subr.bf16.mxu0 %v139_v0  ;;  %v16_v1 = vld [vmem:[%s183_s1] sm:$0xff]  ;;  %v17_v2 = vld [vmem:[%s183_s1 + $0x8] sm:$0xff]  ;;  %v18_v3 = vld [vmem:[%s183_s1 + $0x10] sm:$0xff]  ;;  %123 = vmatprep.mubr.msk.f32.mxu0 %vm140_vm0, %v141_v4  ;;  %v21_v9 = vstv %s185_s2  ;;  %vm102_vm2 = vcmask 7168  }
   0x2   :  { %v127_v5 = vpack.c.bf16 %v17_v2, %v16_v1  ;;  %v19_v6 = vld [vmem:[%s183_s1 + $0x18] sm:$0xff]  ;;  %v15_v8 = vld [vmem:[%s184_s0] sm:$0xff] }
   0x3   :  { %v130_v7 = vpack.c.bf16 %v19_v6, %v18_v3 }
   0x4   :  { %128 = vmatpush3.bf16.msra.mxu0 %v127_v5 }
   0x5   :  { %129 = vmatprep.subr.bf16.mxu0 %v139_v0 }
   0x8   :  { %131 = vmatpush3.bf16.msra.mxu0 %v130_v7 }
   0xb   :  { %124 = vmatmul.mubr.msk.f32.vlgmr.msra.gmra.mrb[0].mxu0 %vm22_vm1, %v15_v8 }
  0xde   :  { %v92_v10 = vpop.f32.mrb[0].mxu0 }
  0xdf   :  { %v93_v11 = vadd.f32 %v92_v10, %v21_v9  ;;  %v125_v12 = vpop.f32.mrb[1].mxu0 }
  0xe1   :  { %v109_v13 = vmul.f32 -1.442695, %v93_v11 }
  0xe3   :  { %135 = vpow2.f32 %v109_v13 }
  0xed   :  { %v136_v14 = vpop.eup %135 }
  0xee   :  { %v99_v15 = vadd.f32 1.0, %v136_v14 }
  0xf0   :  { %137 = vrcp.f32 %v99_v15 }
  0xfa   :  { %v138_v16 = vpop.eup %137 }
  0xfb   :  { %103 = vst.msk [vmem:[%s186_s3] sm:$0xff] %vm102_vm2, %v138_v16 }

</bundles_post_ra>
